<compile_context>
chip_gen: v7x
topology: tpu7x:2x2x1
jax: 0.10.0
libtpu: 0.0.40
codegen_flags: <defaults>
</compile_context>

<pallas_src>
import functools
import math

import jax
import jax.numpy as jnp
from jax.experimental import pallas as pl
from jax.experimental.pallas import tpu as pltpu


def _round_up(x, m):
    return ((x + m - 1) // m) * m


def _sdpa_kernel(q_ref, k_ref, v_ref, mask_ref, ctx_ref, attn_ref, *,
                 scale, mask_per_head, h_tile):
    # Block shapes (batch dim squeezed):
    #   q [h_tile, tq, D], k/v [h_tile, Lk, D], mask [h_tile or 1, tq, Lk]
    #   ctx [h_tile, tq, D], attn [h_tile, tq, Lk]
    scale_v = jnp.asarray(scale, q_ref.dtype)

    def body(t, carry):
        # Fold 1/sqrt(D) into Q (tq*D multiplies instead of tq*Lk).
        q_t = q_ref[t] * scale_v                                   # [tq, D]
        k_t = k_ref[t]                                             # [Lk, D]
        # scores = Q @ K^T, contracting last dims directly (no materialized K^T);
        # f32 accumulation on the MXU.
        scores = jax.lax.dot_general(
            q_t, k_t, (((1,), (1,)), ((), ())),
            preferred_element_type=jnp.float32)                    # [tq, Lk] f32

        m_t = mask_ref[t] if mask_per_head else mask_ref[0]        # int8 [tq, Lk]
        scores = jnp.where(m_t != 0, jnp.float32(-1000000000.0), scores)

        # Numerically-stable softmax over keys; one reciprocal per row (EUP) +
        # a VPU multiply instead of a full [tq, Lk] divide.
        row_max = jnp.max(scores, axis=-1, keepdims=True)
        e = jnp.exp(scores - row_max)
        denom = jnp.sum(e, axis=-1, keepdims=True)
        attn = e * pl.reciprocal(denom, approx=False)              # [tq, Lk] f32

        v_t = v_ref[t]                                             # [Lk, D]
        ctx = jax.lax.dot_general(
            attn.astype(v_t.dtype), v_t, (((1,), (0,)), ((), ())),
            preferred_element_type=jnp.float32)                    # [tq, D] f32

        ctx_ref[t] = ctx.astype(ctx_ref.dtype)
        attn_ref[t] = attn.astype(attn_ref.dtype)
        return carry

    jax.lax.fori_loop(0, h_tile, body, 0, unroll=(h_tile <= 8))


def _vmem_limits():
    """(vmem_limit_bytes for CompilerParams, per-step tile budget in bytes)."""
    try:
        cap = int(pltpu.get_tpu_info().vmem_capacity_bytes)
    except Exception:
        cap = 64 * 1024 * 1024  # conservative fallback (v7x per-core VMEM)
    # v7x (64 MiB)  -> limit 48 MiB;  v5e/v6e (128 MiB) -> limit 96 MiB.
    limit = min(int(cap * 0.75), 96 * 1024 * 1024)
    budget = int(limit * 0.85)  # headroom for Mosaic-internal scratch
    return limit, budget


def _pick_tiles(H, Lq, Lk, D, in_itemsize, out_itemsize, mask_per_head, budget):
    """Pick (h_tile, tq): h_tile divides H, tq multiple of 8, footprint <= budget."""

    def footprint(h_t, t_q):
        mh = h_t if mask_per_head else 1
        io = h_t * t_q * D * in_itemsize            # q
        io += 2 * h_t * Lk * D * in_itemsize        # k, v
        io += mh * t_q * Lk * 1                     # mask (int8)
        io += h_t * t_q * D * out_itemsize          # ctx
        io += h_t * t_q * Lk * out_itemsize         # attn
        io *= 2                                     # double buffering
        tmp = 4 * t_q * Lk * 4 + 2 * t_q * D * 4    # per-head f32 temporaries
        return io + tmp

    tq = min(_round_up(max(Lq, 1), 8), 512)
    while tq > 8 and footprint(1, tq) > budget:
        tq = max(8, _round_up(tq // 2, 8))
    # Avoid gross over-padding: rebalance tq across the number of Lq tiles.
    n_q = -(-Lq // tq)
    tq = _round_up(-(-Lq // n_q), 8)

    h_tile = 1
    for t in range(1, H + 1):
        if H % t == 0 and footprint(t, tq) <= budget:
            h_tile = t
    return h_tile, tq


def scaled_dot_product_attention(Q, K, V, attn_mask, QKVdim):
    """
    Q:         [B, H, Lq, D]
    K, V:      [B, H, Lk, D]
    attn_mask: [B, H, Lq, Lk] or [B, 1, Lq, Lk]  (nonzero/True => masked with -1e9)
    Returns (context [B, H, Lq, D], attn [B, H, Lq, Lk]) in Q.dtype (module semantics).
    """
    B, H, Lq, D = Q.shape
    Lk = K.shape[2]
    assert D == QKVdim

    out_dtype = Q.dtype
    mask_per_head = attn_mask.shape[1] != 1
    mask = (attn_mask != 0).astype(jnp.int8)

    vmem_limit, budget = _vmem_limits()
    h_tile, tq = _pick_tiles(
        H, Lq, Lk, D,
        jnp.dtype(Q.dtype).itemsize, jnp.dtype(out_dtype).itemsize,
        mask_per_head, budget)

    # Pad Lq to a multiple of tq (zero Q rows, unmasked) and slice outputs back.
    Lq_pad = _round_up(Lq, tq)
    if Lq_pad != Lq:
        pad = Lq_pad - Lq
        Q = jnp.pad(Q, ((0, 0), (0, 0), (0, pad), (0, 0)))
        mask = jnp.pad(mask, ((0, 0), (0, 0), (0, pad), (0, 0)))

    grid = (B, H // h_tile, Lq_pad // tq)   # Lq innermost => K/V DMA'd once per (b, h-tile)
    mh = h_tile if mask_per_head else 1

    scale = 1.0 / math.sqrt(QKVdim)
    kernel = functools.partial(_sdpa_kernel, scale=scale,
                               mask_per_head=mask_per_head, h_tile=h_tile)

    mask_idx = (lambda b, h, q: (b, h, q, 0)) if mask_per_head else \
               (lambda b, h, q: (b, 0, q, 0))

    ctx, attn = pl.pallas_call(
        kernel,
        out_shape=(
            jax.ShapeDtypeStruct((B, H, Lq_pad, D), out_dtype),
            jax.ShapeDtypeStruct((B, H, Lq_pad, Lk), out_dtype),
        ),
        grid_spec=pltpu.PrefetchScalarGridSpec(
            num_scalar_prefetch=0,
            grid=grid,
            in_specs=[
                pl.BlockSpec((None, h_tile, tq, D), lambda b, h, q: (b, h, q, 0)),
                pl.BlockSpec((None, h_tile, Lk, D), lambda b, h, q: (b, h, 0, 0)),
                pl.BlockSpec((None, h_tile, Lk, D), lambda b, h, q: (b, h, 0, 0)),
                pl.BlockSpec((None, mh, tq, Lk), mask_idx),
            ],
            out_specs=[
                pl.BlockSpec((None, h_tile, tq, D), lambda b, h, q: (b, h, q, 0)),
                pl.BlockSpec((None, h_tile, tq, Lk), lambda b, h, q: (b, h, q, 0)),
            ],
        ),
        compiler_params=pltpu.CompilerParams(
            dimension_semantics=("parallel", "parallel", "parallel"),
            vmem_limit_bytes=vmem_limit,
        ),
    )(Q, K, V, mask)

    if Lq_pad != Lq:
        ctx = ctx[:, :, :Lq, :]
        attn = attn[:, :, :Lq, :]
    return ctx, attn


def _reference(Q, K, V, attn_mask, QKVdim):
    scores = jnp.einsum("bhqd,bhkd->bhqk", Q, K) / math.sqrt(QKVdim)
    scores = jnp.where(attn_mask, -1000000000.0, scores)
    attn = jax.nn.softmax(scores, axis=-1)
    ctx = jnp.einsum("bhqk,bhkd->bhqd", attn, V)
    return ctx, attn


if __name__ == "__main__":
    B, H, Lq, Lk, D = 2, 4, 10, 16, 32  # QKVdim = 32; Lq=10 exercises the padding path
    key = jax.random.PRNGKey(0)
    kq, kk, kv, km, kp = jax.random.split(key, 5)

    Q = jax.random.normal(kq, (B, H, Lq, D), dtype=jnp.float32)
    K = jax.random.normal(kk, (B, H, Lk, D), dtype=jnp.float32)
    V = jax.random.normal(kv, (B, H, Lk, D), dtype=jnp.float32)
    # boolean mask, True = position is masked out (e.g. padding)
    attn_mask = jax.random.bernoulli(km, p=0.25, shape=(B, H, Lq, Lk))

    ctx, attn = scaled_dot_product_attention(Q, K, V, attn_mask, QKVdim=D)
    jax.block_until_ready((ctx, attn))
    ctx_ref, attn_ref = _reference(Q, K, V, attn_mask, QKVdim=D)
    assert jnp.allclose(ctx, ctx_ref, atol=1e-4, rtol=1e-4)
    assert jnp.allclose(attn, attn_ref, atol=1e-5, rtol=1e-5)

    # Padding-style per-batch mask [B, 1, Lq, Lk], broadcast over heads via the
    # mask BlockSpec index_map (no [B, H, Lq, Lk] materialization / DMA).
    pad_mask = jax.random.bernoulli(kp, p=0.25, shape=(B, 1, Lq, Lk))
    ctx2, attn2 = scaled_dot_product_attention(Q, K, V, pad_mask, QKVdim=D)
    jax.block_until_ready((ctx2, attn2))
    full_mask = jnp.broadcast_to(pad_mask, (B, H, Lq, Lk))
    ctx2_ref, attn2_ref = _reference(Q, K, V, full_mask, QKVdim=D)
    assert jnp.allclose(ctx2, ctx2_ref, atol=1e-4, rtol=1e-4)
    assert jnp.allclose(attn2, attn2_ref, atol=1e-5, rtol=1e-5)

    print("KERNEL_OK")
</pallas_src>

<mosaic_0001>
module attributes {stable_mosaic.version = 11 : i64} {
  func.func @_sdpa_kernel(%arg0: i32, %arg1: i32, %arg2: i32, %arg3: memref<1x4x16x32xf32, #tpu.memory_space<vmem>>, %arg4: memref<1x4x16x32xf32, #tpu.memory_space<vmem>>, %arg5: memref<1x4x16x32xf32, #tpu.memory_space<vmem>>, %arg6: memref<1x4x16x16xi8, #tpu.memory_space<vmem>>, %arg7: memref<1x4x16x32xf32, #tpu.memory_space<vmem>>, %arg8: memref<1x4x16x16xf32, #tpu.memory_space<vmem>>) attributes {dimension_semantics = [#tpu.dimension_semantics<parallel>, #tpu.dimension_semantics<parallel>, #tpu.dimension_semantics<parallel>], iteration_bounds = array<i64: 2, 1, 1>, scalar_prefetch = 0 : i64, scratch_operands = 0 : i64, tpu.core_type = #tpu.core_type<tc>, window_params = [{transform_indices = @transform_0, window_bounds = array<i64: 1, 4, 16, 32>}, {transform_indices = @transform_1, window_bounds = array<i64: 1, 4, 16, 32>}, {transform_indices = @transform_2, window_bounds = array<i64: 1, 4, 16, 32>}, {transform_indices = @transform_3, window_bounds = array<i64: 1, 4, 16, 16>}, {transform_indices = @transform_4, window_bounds = array<i64: 1, 4, 16, 32>}, {transform_indices = @transform_5, window_bounds = array<i64: 1, 4, 16, 16>}]} {
    %cst = arith.constant 0.176776692 : f32
    %c0_i32 = arith.constant 0 : i32
    %c0 = arith.constant 0 : index
    %0 = arith.index_cast %c0_i32 : i32 to index
    %c0_0 = arith.constant 0 : index
    %c0_1 = arith.constant 0 : index
    %1 = vector.load %arg3[%c0, %0, %c0_0, %c0_1] : memref<1x4x16x32xf32, #tpu.memory_space<vmem>>, vector<1x1x16x32xf32>
    %2 = vector.shape_cast %1 : vector<1x1x16x32xf32> to vector<16x32xf32>
    %3 = vector.broadcast %cst : f32 to vector<16x32xf32>
    %4 = arith.mulf %2, %3 : vector<16x32xf32>
    %c0_2 = arith.constant 0 : index
    %5 = arith.index_cast %c0_i32 : i32 to index
    %c0_3 = arith.constant 0 : index
    %c0_4 = arith.constant 0 : index
    %6 = vector.load %arg4[%c0_2, %5, %c0_3, %c0_4] : memref<1x4x16x32xf32, #tpu.memory_space<vmem>>, vector<1x1x16x32xf32>
    %7 = vector.shape_cast %6 : vector<1x1x16x32xf32> to vector<16x32xf32>
    %cst_5 = arith.constant dense<0.000000e+00> : vector<16x16xf32>
    %8 = tpu.matmul %4, %7, %cst_5 {dimension_numbers = #tpu.dot_dimension_numbers<[1], [1], [0], [0], [0, 0, 1, 0], [], []>} : vector<16x32xf32>, vector<16x32xf32>, vector<16x16xf32> -> vector<16x16xf32>
    %c0_6 = arith.constant 0 : index
    %9 = arith.index_cast %c0_i32 : i32 to index
    %c0_7 = arith.constant 0 : index
    %c0_8 = arith.constant 0 : index
    %10 = vector.load %arg6[%c0_6, %9, %c0_7, %c0_8] : memref<1x4x16x16xi8, #tpu.memory_space<vmem>>, vector<1x1x16x16xi8>
    %11 = vector.shape_cast %10 : vector<1x1x16x16xi8> to vector<16x16xi8>
    %c0_i8 = arith.constant 0 : i8
    %12 = vector.broadcast %c0_i8 : i8 to vector<16x16xi8>
    %13 = arith.cmpi ne, %11, %12 : vector<16x16xi8>
    %cst_9 = arith.constant -1.000000e+09 : f32
    %14 = vector.broadcast %cst_9 : f32 to vector<16x16xf32>
    %15 = arith.select %13, %14, %8 : vector<16x16xi1>, vector<16x16xf32>
    %cst_10 = arith.constant dense<0xFF800000> : vector<16xf32>
    %16 = vector.multi_reduction <maximumf>, %15, %cst_10 [1] : vector<16x16xf32> to vector<16xf32>
    %17 = vector.shape_cast %16 : vector<16xf32> to vector<16x1xf32>
    %18 = vector.broadcast %17 : vector<16x1xf32> to vector<16x16xf32>
    %19 = arith.subf %15, %18 : vector<16x16xf32>
    %20 = math.exp %19 : vector<16x16xf32>
    %cst_11 = arith.constant dense<0.000000e+00> : vector<16xf32>
    %21 = vector.multi_reduction <add>, %20, %cst_11 [1] : vector<16x16xf32> to vector<16xf32>
    %22 = vector.shape_cast %21 : vector<16xf32> to vector<16x1xf32>
    %23 = tpu.reciprocal %22 : vector<16x1xf32> -> vector<16x1xf32>
    %24 = vector.broadcast %23 : vector<16x1xf32> to vector<16x16xf32>
    %25 = arith.mulf %20, %24 : vector<16x16xf32>
    %c0_12 = arith.constant 0 : index
    %26 = arith.index_cast %c0_i32 : i32 to index
    %c0_13 = arith.constant 0 : index
    %c0_14 = arith.constant 0 : index
    %27 = vector.load %arg5[%c0_12, %26, %c0_13, %c0_14] : memref<1x4x16x32xf32, #tpu.memory_space<vmem>>, vector<1x1x16x32xf32>
    %28 = vector.shape_cast %27 : vector<1x1x16x32xf32> to vector<16x32xf32>
    %cst_15 = arith.constant dense<0.000000e+00> : vector<16x32xf32>
    %29 = tpu.matmul %25, %28, %cst_15 {dimension_numbers = #tpu.dot_dimension_numbers<[1], [0], [0], [1], [0, 0, 1, 1], [], []>} : vector<16x16xf32>, vector<16x32xf32>, vector<16x32xf32> -> vector<16x32xf32>
    %c0_16 = arith.constant 0 : index
    %30 = arith.index_cast %c0_i32 : i32 to index
    %c0_17 = arith.constant 0 : index
    %c0_18 = arith.constant 0 : index
    %31 = vector.load %arg7[%c0_16, %30, %c0_17, %c0_18] : memref<1x4x16x32xf32, #tpu.memory_space<vmem>>, vector<1x1x16x32xf32>
    %32 = vector.shape_cast %31 : vector<1x1x16x32xf32> to vector<16x32xf32>
    %33 = vector.shape_cast %29 : vector<16x32xf32> to vector<1x1x16x32xf32>
    tpu.vector_store %arg7[%c0_16, %30, %c0_17, %c0_18], %33 {strides = array<i32>} : memref<1x4x16x32xf32, #tpu.memory_space<vmem>>, vector<1x1x16x32xf32>,
    %c0_19 = arith.constant 0 : index
    %34 = arith.index_cast %c0_i32 : i32 to index
    %c0_20 = arith.constant 0 : index
    %c0_21 = arith.constant 0 : index
    %35 = vector.load %arg8[%c0_19, %34, %c0_20, %c0_21] : memref<1x4x16x16xf32, #tpu.memory_space<vmem>>, vector<1x1x16x16xf32>
    %36 = vector.shape_cast %35 : vector<1x1x16x16xf32> to vector<16x16xf32>
    %37 = vector.shape_cast %25 : vector<16x16xf32> to vector<1x1x16x16xf32>
    tpu.vector_store %arg8[%c0_19, %34, %c0_20, %c0_21], %37 {strides = array<i32>} : memref<1x4x16x16xf32, #tpu.memory_space<vmem>>, vector<1x1x16x16xf32>,
    %c1_i32 = arith.constant 1 : i32
    %c0_22 = arith.constant 0 : index
    %38 = arith.index_cast %c1_i32 : i32 to index
    %c0_23 = arith.constant 0 : index
    %c0_24 = arith.constant 0 : index
    %39 = vector.load %arg3[%c0_22, %38, %c0_23, %c0_24] : memref<1x4x16x32xf32, #tpu.memory_space<vmem>>, vector<1x1x16x32xf32>
    %40 = vector.shape_cast %39 : vector<1x1x16x32xf32> to vector<16x32xf32>
    %41 = vector.broadcast %cst : f32 to vector<16x32xf32>
    %42 = arith.mulf %40, %41 : vector<16x32xf32>
    %c0_25 = arith.constant 0 : index
    %43 = arith.index_cast %c1_i32 : i32 to index
    %c0_26 = arith.constant 0 : index
    %c0_27 = arith.constant 0 : index
    %44 = vector.load %arg4[%c0_25, %43, %c0_26, %c0_27] : memref<1x4x16x32xf32, #tpu.memory_space<vmem>>, vector<1x1x16x32xf32>
    %45 = vector.shape_cast %44 : vector<1x1x16x32xf32> to vector<16x32xf32>
    %cst_28 = arith.constant dense<0.000000e+00> : vector<16x16xf32>
    %46 = tpu.matmul %42, %45, %cst_28 {dimension_numbers = #tpu.dot_dimension_numbers<[1], [1], [0], [0], [0, 0, 1, 0], [], []>} : vector<16x32xf32>, vector<16x32xf32>, vector<16x16xf32> -> vector<16x16xf32>
    %c0_29 = arith.constant 0 : index
    %47 = arith.index_cast %c1_i32 : i32 to index
    %c0_30 = arith.constant 0 : index
    %c0_31 = arith.constant 0 : index
    %48 = vector.load %arg6[%c0_29, %47, %c0_30, %c0_31] : memref<1x4x16x16xi8, #tpu.memory_space<vmem>>, vector<1x1x16x16xi8>
    %49 = vector.shape_cast %48 : vector<1x1x16x16xi8> to vector<16x16xi8>
    %c0_i8_32 = arith.constant 0 : i8
    %50 = vector.broadcast %c0_i8_32 : i8 to vector<16x16xi8>
    %51 = arith.cmpi ne, %49, %50 : vector<16x16xi8>
    %cst_33 = arith.constant -1.000000e+09 : f32
    %52 = vector.broadcast %cst_33 : f32 to vector<16x16xf32>
    %53 = arith.select %51, %52, %46 : vector<16x16xi1>, vector<16x16xf32>
    %cst_34 = arith.constant dense<0xFF800000> : vector<16xf32>
    %54 = vector.multi_reduction <maximumf>, %53, %cst_34 [1] : vector<16x16xf32> to vector<16xf32>
    %55 = vector.shape_cast %54 : vector<16xf32> to vector<16x1xf32>
    %56 = vector.broadcast %55 : vector<16x1xf32> to vector<16x16xf32>
    %57 = arith.subf %53, %56 : vector<16x16xf32>
    %58 = math.exp %57 : vector<16x16xf32>
    %cst_35 = arith.constant dense<0.000000e+00> : vector<16xf32>
    %59 = vector.multi_reduction <add>, %58, %cst_35 [1] : vector<16x16xf32> to vector<16xf32>
    %60 = vector.shape_cast %59 : vector<16xf32> to vector<16x1xf32>
    %61 = tpu.reciprocal %60 : vector<16x1xf32> -> vector<16x1xf32>
    %62 = vector.broadcast %61 : vector<16x1xf32> to vector<16x16xf32>
    %63 = arith.mulf %58, %62 : vector<16x16xf32>
    %c0_36 = arith.constant 0 : index
    %64 = arith.index_cast %c1_i32 : i32 to index
    %c0_37 = arith.constant 0 : index
    %c0_38 = arith.constant 0 : index
    %65 = vector.load %arg5[%c0_36, %64, %c0_37, %c0_38] : memref<1x4x16x32xf32, #tpu.memory_space<vmem>>, vector<1x1x16x32xf32>
    %66 = vector.shape_cast %65 : vector<1x1x16x32xf32> to vector<16x32xf32>
    %cst_39 = arith.constant dense<0.000000e+00> : vector<16x32xf32>
    %67 = tpu.matmul %63, %66, %cst_39 {dimension_numbers = #tpu.dot_dimension_numbers<[1], [0], [0], [1], [0, 0, 1, 1], [], []>} : vector<16x16xf32>, vector<16x32xf32>, vector<16x32xf32> -> vector<16x32xf32>
    %c0_40 = arith.constant 0 : index
    %68 = arith.index_cast %c1_i32 : i32 to index
    %c0_41 = arith.constant 0 : index
    %c0_42 = arith.constant 0 : index
    %69 = vector.load %arg7[%c0_40, %68, %c0_41, %c0_42] : memref<1x4x16x32xf32, #tpu.memory_space<vmem>>, vector<1x1x16x32xf32>
    %70 = vector.shape_cast %69 : vector<1x1x16x32xf32> to vector<16x32xf32>
    %71 = vector.shape_cast %67 : vector<16x32xf32> to vector<1x1x16x32xf32>
    tpu.vector_store %arg7[%c0_40, %68, %c0_41, %c0_42], %71 {strides = array<i32>} : memref<1x4x16x32xf32, #tpu.memory_space<vmem>>, vector<1x1x16x32xf32>,
    %c0_43 = arith.constant 0 : index
    %72 = arith.index_cast %c1_i32 : i32 to index
    %c0_44 = arith.constant 0 : index
    %c0_45 = arith.constant 0 : index
    %73 = vector.load %arg8[%c0_43, %72, %c0_44, %c0_45] : memref<1x4x16x16xf32, #tpu.memory_space<vmem>>, vector<1x1x16x16xf32>
    %74 = vector.shape_cast %73 : vector<1x1x16x16xf32> to vector<16x16xf32>
    %75 = vector.shape_cast %63 : vector<16x16xf32> to vector<1x1x16x16xf32>
    tpu.vector_store %arg8[%c0_43, %72, %c0_44, %c0_45], %75 {strides = array<i32>} : memref<1x4x16x16xf32, #tpu.memory_space<vmem>>, vector<1x1x16x16xf32>,
    %c2_i32 = arith.constant 2 : i32
    %c0_46 = arith.constant 0 : index
    %76 = arith.index_cast %c2_i32 : i32 to index
    %c0_47 = arith.constant 0 : index
    %c0_48 = arith.constant 0 : index
    %77 = vector.load %arg3[%c0_46, %76, %c0_47, %c0_48] : memref<1x4x16x32xf32, #tpu.memory_space<vmem>>, vector<1x1x16x32xf32>
    %78 = vector.shape_cast %77 : vector<1x1x16x32xf32> to vector<16x32xf32>
    %79 = vector.broadcast %cst : f32 to vector<16x32xf32>
    %80 = arith.mulf %78, %79 : vector<16x32xf32>
    %c0_49 = arith.constant 0 : index
    %81 = arith.index_cast %c2_i32 : i32 to index
    %c0_50 = arith.constant 0 : index
    %c0_51 = arith.constant 0 : index
    %82 = vector.load %arg4[%c0_49, %81, %c0_50, %c0_51] : memref<1x4x16x32xf32, #tpu.memory_space<vmem>>, vector<1x1x16x32xf32>
    %83 = vector.shape_cast %82 : vector<1x1x16x32xf32> to vector<16x32xf32>
    %cst_52 = arith.constant dense<0.000000e+00> : vector<16x16xf32>
    %84 = tpu.matmul %80, %83, %cst_52 {dimension_numbers = #tpu.dot_dimension_numbers<[1], [1], [0], [0], [0, 0, 1, 0], [], []>} : vector<16x32xf32>, vector<16x32xf32>, vector<16x16xf32> -> vector<16x16xf32>
    %c0_53 = arith.constant 0 : index
    %85 = arith.index_cast %c2_i32 : i32 to index
    %c0_54 = arith.constant 0 : index
    %c0_55 = arith.constant 0 : index
    %86 = vector.load %arg6[%c0_53, %85, %c0_54, %c0_55] : memref<1x4x16x16xi8, #tpu.memory_space<vmem>>, vector<1x1x16x16xi8>
    %87 = vector.shape_cast %86 : vector<1x1x16x16xi8> to vector<16x16xi8>
    %c0_i8_56 = arith.constant 0 : i8
    %88 = vector.broadcast %c0_i8_56 : i8 to vector<16x16xi8>
    %89 = arith.cmpi ne, %87, %88 : vector<16x16xi8>
    %cst_57 = arith.constant -1.000000e+09 : f32
    %90 = vector.broadcast %cst_57 : f32 to vector<16x16xf32>
    %91 = arith.select %89, %90, %84 : vector<16x16xi1>, vector<16x16xf32>
    %cst_58 = arith.constant dense<0xFF800000> : vector<16xf32>
    %92 = vector.multi_reduction <maximumf>, %91, %cst_58 [1] : vector<16x16xf32> to vector<16xf32>
    %93 = vector.shape_cast %92 : vector<16xf32> to vector<16x1xf32>
    %94 = vector.broadcast %93 : vector<16x1xf32> to vector<16x16xf32>
    %95 = arith.subf %91, %94 : vector<16x16xf32>
    %96 = math.exp %95 : vector<16x16xf32>
    %cst_59 = arith.constant dense<0.000000e+00> : vector<16xf32>
    %97 = vector.multi_reduction <add>, %96, %cst_59 [1] : vector<16x16xf32> to vector<16xf32>
    %98 = vector.shape_cast %97 : vector<16xf32> to vector<16x1xf32>
    %99 = tpu.reciprocal %98 : vector<16x1xf32> -> vector<16x1xf32>
    %100 = vector.broadcast %99 : vector<16x1xf32> to vector<16x16xf32>
    %101 = arith.mulf %96, %100 : vector<16x16xf32>
    %c0_60 = arith.constant 0 : index
    %102 = arith.index_cast %c2_i32 : i32 to index
    %c0_61 = arith.constant 0 : index
    %c0_62 = arith.constant 0 : index
    %103 = vector.load %arg5[%c0_60, %102, %c0_61, %c0_62] : memref<1x4x16x32xf32, #tpu.memory_space<vmem>>, vector<1x1x16x32xf32>
    %104 = vector.shape_cast %103 : vector<1x1x16x32xf32> to vector<16x32xf32>
    %cst_63 = arith.constant dense<0.000000e+00> : vector<16x32xf32>
    %105 = tpu.matmul %101, %104, %cst_63 {dimension_numbers = #tpu.dot_dimension_numbers<[1], [0], [0], [1], [0, 0, 1, 1], [], []>} : vector<16x16xf32>, vector<16x32xf32>, vector<16x32xf32> -> vector<16x32xf32>
    %c0_64 = arith.constant 0 : index
    %106 = arith.index_cast %c2_i32 : i32 to index
    %c0_65 = arith.constant 0 : index
    %c0_66 = arith.constant 0 : index
    %107 = vector.load %arg7[%c0_64, %106, %c0_65, %c0_66] : memref<1x4x16x32xf32, #tpu.memory_space<vmem>>, vector<1x1x16x32xf32>
    %108 = vector.shape_cast %107 : vector<1x1x16x32xf32> to vector<16x32xf32>
    %109 = vector.shape_cast %105 : vector<16x32xf32> to vector<1x1x16x32xf32>
    tpu.vector_store %arg7[%c0_64, %106, %c0_65, %c0_66], %109 {strides = array<i32>} : memref<1x4x16x32xf32, #tpu.memory_space<vmem>>, vector<1x1x16x32xf32>,
    %c0_67 = arith.constant 0 : index
    %110 = arith.index_cast %c2_i32 : i32 to index
    %c0_68 = arith.constant 0 : index
    %c0_69 = arith.constant 0 : index
    %111 = vector.load %arg8[%c0_67, %110, %c0_68, %c0_69] : memref<1x4x16x16xf32, #tpu.memory_space<vmem>>, vector<1x1x16x16xf32>
    %112 = vector.shape_cast %111 : vector<1x1x16x16xf32> to vector<16x16xf32>
    %113 = vector.shape_cast %101 : vector<16x16xf32> to vector<1x1x16x16xf32>
    tpu.vector_store %arg8[%c0_67, %110, %c0_68, %c0_69], %113 {strides = array<i32>} : memref<1x4x16x16xf32, #tpu.memory_space<vmem>>, vector<1x1x16x16xf32>,
    %c3_i32 = arith.constant 3 : i32
    %c0_70 = arith.constant 0 : index
    %114 = arith.index_cast %c3_i32 : i32 to index
    %c0_71 = arith.constant 0 : index
    %c0_72 = arith.constant 0 : index
    %115 = vector.load %arg3[%c0_70, %114, %c0_71, %c0_72] : memref<1x4x16x32xf32, #tpu.memory_space<vmem>>, vector<1x1x16x32xf32>
    %116 = vector.shape_cast %115 : vector<1x1x16x32xf32> to vector<16x32xf32>
    %117 = vector.broadcast %cst : f32 to vector<16x32xf32>
    %118 = arith.mulf %116, %117 : vector<16x32xf32>
    %c0_73 = arith.constant 0 : index
    %119 = arith.index_cast %c3_i32 : i32 to index
    %c0_74 = arith.constant 0 : index
    %c0_75 = arith.constant 0 : index
    %120 = vector.load %arg4[%c0_73, %119, %c0_74, %c0_75] : memref<1x4x16x32xf32, #tpu.memory_space<vmem>>, vector<1x1x16x32xf32>
    %121 = vector.shape_cast %120 : vector<1x1x16x32xf32> to vector<16x32xf32>
    %cst_76 = arith.constant dense<0.000000e+00> : vector<16x16xf32>
    %122 = tpu.matmul %118, %121, %cst_76 {dimension_numbers = #tpu.dot_dimension_numbers<[1], [1], [0], [0], [0, 0, 1, 0], [], []>} : vector<16x32xf32>, vector<16x32xf32>, vector<16x16xf32> -> vector<16x16xf32>
    %c0_77 = arith.constant 0 : index
    %123 = arith.index_cast %c3_i32 : i32 to index
    %c0_78 = arith.constant 0 : index
    %c0_79 = arith.constant 0 : index
    %124 = vector.load %arg6[%c0_77, %123, %c0_78, %c0_79] : memref<1x4x16x16xi8, #tpu.memory_space<vmem>>, vector<1x1x16x16xi8>
    %125 = vector.shape_cast %124 : vector<1x1x16x16xi8> to vector<16x16xi8>
    %c0_i8_80 = arith.constant 0 : i8
    %126 = vector.broadcast %c0_i8_80 : i8 to vector<16x16xi8>
    %127 = arith.cmpi ne, %125, %126 : vector<16x16xi8>
    %cst_81 = arith.constant -1.000000e+09 : f32
    %128 = vector.broadcast %cst_81 : f32 to vector<16x16xf32>
    %129 = arith.select %127, %128, %122 : vector<16x16xi1>, vector<16x16xf32>
    %cst_82 = arith.constant dense<0xFF800000> : vector<16xf32>
    %130 = vector.multi_reduction <maximumf>, %129, %cst_82 [1] : vector<16x16xf32> to vector<16xf32>
    %131 = vector.shape_cast %130 : vector<16xf32> to vector<16x1xf32>
    %132 = vector.broadcast %131 : vector<16x1xf32> to vector<16x16xf32>
    %133 = arith.subf %129, %132 : vector<16x16xf32>
    %134 = math.exp %133 : vector<16x16xf32>
    %cst_83 = arith.constant dense<0.000000e+00> : vector<16xf32>
    %135 = vector.multi_reduction <add>, %134, %cst_83 [1] : vector<16x16xf32> to vector<16xf32>
    %136 = vector.shape_cast %135 : vector<16xf32> to vector<16x1xf32>
    %137 = tpu.reciprocal %136 : vector<16x1xf32> -> vector<16x1xf32>
    %138 = vector.broadcast %137 : vector<16x1xf32> to vector<16x16xf32>
    %139 = arith.mulf %134, %138 : vector<16x16xf32>
    %c0_84 = arith.constant 0 : index
    %140 = arith.index_cast %c3_i32 : i32 to index
    %c0_85 = arith.constant 0 : index
    %c0_86 = arith.constant 0 : index
    %141 = vector.load %arg5[%c0_84, %140, %c0_85, %c0_86] : memref<1x4x16x32xf32, #tpu.memory_space<vmem>>, vector<1x1x16x32xf32>
    %142 = vector.shape_cast %141 : vector<1x1x16x32xf32> to vector<16x32xf32>
    %cst_87 = arith.constant dense<0.000000e+00> : vector<16x32xf32>
    %143 = tpu.matmul %139, %142, %cst_87 {dimension_numbers = #tpu.dot_dimension_numbers<[1], [0], [0], [1], [0, 0, 1, 1], [], []>} : vector<16x16xf32>, vector<16x32xf32>, vector<16x32xf32> -> vector<16x32xf32>
    %c0_88 = arith.constant 0 : index
    %144 = arith.index_cast %c3_i32 : i32 to index
    %c0_89 = arith.constant 0 : index
    %c0_90 = arith.constant 0 : index
    %145 = vector.load %arg7[%c0_88, %144, %c0_89, %c0_90] : memref<1x4x16x32xf32, #tpu.memory_space<vmem>>, vector<1x1x16x32xf32>
    %146 = vector.shape_cast %145 : vector<1x1x16x32xf32> to vector<16x32xf32>
    %147 = vector.shape_cast %143 : vector<16x32xf32> to vector<1x1x16x32xf32>
    tpu.vector_store %arg7[%c0_88, %144, %c0_89, %c0_90], %147 {strides = array<i32>} : memref<1x4x16x32xf32, #tpu.memory_space<vmem>>, vector<1x1x16x32xf32>,
    %c0_91 = arith.constant 0 : index
    %148 = arith.index_cast %c3_i32 : i32 to index
    %c0_92 = arith.constant 0 : index
    %c0_93 = arith.constant 0 : index
    %149 = vector.load %arg8[%c0_91, %148, %c0_92, %c0_93] : memref<1x4x16x16xf32, #tpu.memory_space<vmem>>, vector<1x1x16x16xf32>
    %150 = vector.shape_cast %149 : vector<1x1x16x16xf32> to vector<16x16xf32>
    %151 = vector.shape_cast %139 : vector<16x16xf32> to vector<1x1x16x16xf32>
    tpu.vector_store %arg8[%c0_91, %148, %c0_92, %c0_93], %151 {strides = array<i32>} : memref<1x4x16x16xf32, #tpu.memory_space<vmem>>, vector<1x1x16x16xf32>,
    %c4_i32 = arith.constant 4 : i32
    return
  }
  func.func @transform_0(%arg0: i32, %arg1: i32, %arg2: i32) -> (i32, i32, i32, i32) {
    %c0_i32 = arith.constant 0 : i32
    %c0_i32_0 = arith.constant 0 : i32
    return %arg0, %arg1, %arg2, %c0_i32 : i32, i32, i32, i32
  }
  func.func @transform_1(%arg0: i32, %arg1: i32, %arg2: i32) -> (i32, i32, i32, i32) {
    %c0_i32 = arith.constant 0 : i32
    %c0_i32_0 = arith.constant 0 : i32
    %c0_i32_1 = arith.constant 0 : i32
    return %arg0, %arg1, %c0_i32, %c0_i32_0 : i32, i32, i32, i32
  }
  func.func @transform_2(%arg0: i32, %arg1: i32, %arg2: i32) -> (i32, i32, i32, i32) {
    %c0_i32 = arith.constant 0 : i32
    %c0_i32_0 = arith.constant 0 : i32
    %c0_i32_1 = arith.constant 0 : i32
    return %arg0, %arg1, %c0_i32, %c0_i32_0 : i32, i32, i32, i32
  }
  func.func @transform_3(%arg0: i32, %arg1: i32, %arg2: i32) -> (i32, i32, i32, i32) {
    %c0_i32 = arith.constant 0 : i32
    %c0_i32_0 = arith.constant 0 : i32
    return %arg0, %arg1, %arg2, %c0_i32 : i32, i32, i32, i32
  }
  func.func @transform_4(%arg0: i32, %arg1: i32, %arg2: i32) -> (i32, i32, i32, i32) {
    %c0_i32 = arith.constant 0 : i32
    %c0_i32_0 = arith.constant 0 : i32
    return %arg0, %arg1, %arg2, %c0_i32 : i32, i32, i32, i32
  }
  func.func @transform_5(%arg0: i32, %arg1: i32, %arg2: i32) -> (i32, i32, i32, i32) {
    %c0_i32 = arith.constant 0 : i32
    %c0_i32_0 = arith.constant 0 : i32
    return %arg0, %arg1, %arg2, %c0_i32 : i32, i32, i32, i32
  }
}

</mosaic_0001>

<bundles_post_ra>
// kernel: tpu_custom_call.1
= control target key start
LH: loop header
LB: loop body
LE: loop exit
PB: predicated region body
PF: predicated region fallthrough
CT: control target
= control target key end

     0   :  { %s2706_s0 = inlined_call_operand.hbm [shape: f32[2,4,16,32], index: 0, kind: input, shape index: {}]   ;;  %s2707_s1 = inlined_call_operand.hbm [shape: f32[2,4,16,32], index: 1, kind: input, shape index: {}]   ;;  %s2708_s2 = inlined_call_operand.hbm [shape: f32[2,4,16,32], index: 2, kind: input, shape index: {}]   ;;  %s2709_s3 = inlined_call_operand.hbm [shape: s8[2,4,16,16], index: 3, kind: input, shape index: {}]   ;;  %s2710_s4 = inlined_call_operand.hbm [shape: f32[2,4,16,32], index: 4, kind: output, shape index: {0}]   ;;  %s2711_s5 = inlined_call_operand.hbm [shape: f32[2,4,16,16], index: 5, kind: output, shape index: {1}]  }
   0x1   :  { %2724 = sst [smem:[#allocation24_spill]] %s2706_s0 }
   0x2   :  { %2725 = sst [smem:[#allocation25_spill]] %s2707_s1 }
   0x3   :  { %11 = vsyncpa [#allocation3], 0 }
   0x4   :  { %13 = vsyncpa [#allocation3 + $0x1], 0 }
   0x5   :  { %14 = vsyncpa [#allocation6], 0 }
   0x6   :  { %16 = vsyncpa [#allocation6 + $0x1], 0 }
   0x7   :  { %17 = vsyncpa [#allocation9], 0 }
   0x8   :  { %19 = vsyncpa [#allocation9 + $0x1], 0 }
   0x9   :  { %20 = vsyncpa [#allocation4], 0 }
   0xa   :  { %22 = vsyncpa [#allocation4 + $0x1], 0 }
   0xb   :  { %23 = vsyncpa [#allocation12], 0 }
   0xc   :  { %25 = vsyncpa [#allocation12 + $0x1], 0  ;;  %s2200_s18 = smov 0   ;;  %s2202_s19 = smov 0  }
   0xd   :  { %s2204_s20 = smov 0   ;;  %s2206_s21 = smov 0  }
   0xe   :  { %s2208_s22 = smov 0   ;;  %s2210_s23 = smov 0  }
   0xf LB: > { %2726 = sst [smem:[#allocation18_spill]] %s2135_s18  ;;  %s2231_s24 = sadd.s32 4294967295, %s2155_s23   ;;  %s2155_s23 = sphi %s2210_s23, %s31_s23   ;;  %s2151_s22 = sphi %s2208_s22, %s2761_s22   ;;  %s2147_s21 = sphi %s2206_s21, %s2760_s21   ;;  %s2143_s20 = sphi %s2204_s20, %s2756_s20   ;;  %s2139_s19 = sphi %s2202_s19, %s2759_s19   ;;  %s2135_s18 = sphi %s2200_s18, %s2758_s18  }
  0x10   : > { %2727 = sst [smem:[#allocation19_spill]] %s2143_s20  ;;  %s1568_s25 = sadd.s32 4294967294, %s2155_s23  }
  0x11   : > { %2728 = sst [smem:[#allocation20_spill]] %s2155_s23  ;;  %s50_s26 = sadd.s32 1, %s2151_s22 }
  0x12   : > { %s61_s27 = sadd.s32 1, %s2143_s20  ;;  %p52_p0 = scmp.ge.s32.totalorder %s50_s26, 2 }
  0x13   : > { %p68_p1 = scmp.ne.s32.totalorder %s2143_s20, %s2139_s19  ;;  %p69_p2 = scmp.eq.s32.totalorder %s2155_s23, 0 }
  0x14   : > { %p74_p3 = scmp.ne.s32.totalorder %s2139_s19, %s2135_s18  ;;  %s2763_s26 = smov (%p52_p0, %s50_s26), 0 }
  0x15   : > { %2729 = sst [smem:[#allocation21_spill]] %s2763_s26  ;;  %p2243_p4 = por %p69_p2, %p68_p1 }
  0x16   : > { %p75_p5 = scmp.eq.s32.totalorder %s2231_s24, 0  ;;  %s54_s29 = ssub.s32 %s2151_s22, %s2763_s26 }
  0x17   : > { %p188_p6 = scmp.eq.s32.totalorder %s2231_s24, 1  ;;  %p59_p7 = scmp.eq.s32.totalorder %s54_s29, 0 }
  0x18   : > { %p2251_p8 = por %p75_p5, %p74_p3  ;;  %p194_p10 = scmp.eq.s32.totalorder %s1568_s25, 1 }
  0x19   : > { %p2255_p9 = por %p188_p6, %p68_p1  ;;  %p1824_p13 = scmp.lt.s32.totalorder %s2155_s23, 2 }
  0x1a   : > { %s2731_s30 = scalar_select %p2251_p8, 1, 0 }
  0x1b   : > { %s2732_s6 = scalar_select %p2255_p9, 1, 0 }
  0x1c   : > { %s2260_s7 = scalar_select %p59_p7, %s2143_s20, %s61_s27  }
  0x1d   : > { %p2262_p11 = por %p194_p10, %p74_p3  ;;  %s2269_s9 = sand.u32 1, %s2143_s20  }
  0x1e   : > { %2733 = sst [smem:[#allocation22_spill]] %s2260_s7  ;;  %s2272_s10 = sshll.u32 %s2269_s9, 6 }
  0x1f   : > { %s2734_s8 = scalar_select %p2262_p11, 1, 0 }
  0x20   : > { %s2275_s11 = sshll.u32 %s2151_s22, 10  ;;  %p2279_p0 = pnand %p1824_p13, %p2243_p4 }
  0x21   : > { %2735 = sst [smem:[#allocation23_spill]] %s2734_s8  ;;  %s270_s13 = sand.u32 1, %s2155_s23  }
  0x22   : > { %s2737_s1 = sld [smem:[#allocation25_spill]]  ;;  %s274_s17 = scalar_lea.vmem [#allocation5], %s2272_s10 }
  0x23   : > { %s284_s25 = sshll.u32 %s274_s17, 4  ;;  %s2295_s27 = scalar_lea.sflag [#allocation6], %s270_s13  ;;  %s2292_s25 = int_to_ptr.vmem [resolvable:$true] %s284_s25 }
  0x24   : > { %p2301_p4 = pneg %p2279_p0 }
  0x28   : > { %s2288_s16 = scalar_lea.hbm %s2737_s1, %s2275_s11  ;;  %s1918_s17 = scalar_lea.hbm %s2737_s1, 2048 }
  0x29   : > { %s1913_s28 = scalar_lea.hbm %s2288_s16, 1024  ;;  %p1919_p7 = scmp.lt.u32.totalorder %s2288_s16, %s2737_s1 }
  0x2a   : > { %p1914_p3 = scmp.ne.s32.totalorder %s2288_s16, %s1913_s28  ;;  %p1920_p10 = scmp.lt.u32.totalorder %s1918_s17, %s1913_s28 }
  0x2b   : > { %p1922_p12 = scmp.lt.u32.totalorder %s1913_s28, %s2288_s16 }
  0x2c   : > { %p1916_p5 = pnand %p2301_p4, %p1914_p3  ;;  %p1921_p13 = por %p1920_p10, %p1919_p7 }
  0x2e   : > { %p1917_p6 = pneg %p1916_p5  ;;  %p1923_p1 = por %p1922_p12, %p1921_p13 }
  0x30   : > { %p1924_p2 = pnand %p1923_p1, %p1917_p6 }
  0x32   : > { %1927 = shalt.err (!%p1924_p2)
}
  0x33   : > { %s1928_s13 = scalar_lea.vmem %s2292_s25, 1024  ;;  %s2157_s14 = smov [#allocation5]  }
  0x34   : > { %p1929_p3 = scmp.ne.s32.totalorder %s2292_s25, %s1928_s13  ;;  %s1933_s15 = sshll.u32 %s2157_s14, 4  ;;  %s1934_s15 = int_to_ptr.vmem [resolvable:$false] %s1933_s15 }
  0x35   : > { %s1935_s26 = scalar_lea.vmem %s1934_s15, 2048  ;;  %p1936_p9 = scmp.lt.s32.totalorder %s2292_s25, %s1934_s15 }
  0x36   : > { %p1931_p5 = pnand %p1929_p3, %p2301_p4  ;;  %p1937_p8 = scmp.lt.s32.totalorder %s1935_s26, %s1928_s13 }
  0x38   : > { %p1932_p11 = pneg %p1931_p5  ;;  %p1938_p7 = por %p1937_p8, %p1936_p9 }
  0x3a   : > { %p1939_p10 = pnand %p1938_p7, %p1932_p11 }
  0x3c   : > { %1942 = shalt.err (!%p1939_p10)
}
  0x3d   : > { %s2715_s7 = smov 128   ;;  %s2717_s28 = smov 8  }
  0x3e   : > { %1810 = dma.hbm_to_vmem [thread:$0]  (!%p2279_p0), %s2288_s16, 1024, %s2292_s25, %s2295_s27, %s2715_s7, %s2715_s7, %s2717_s28  }
  0x3f   : > { %p2739_p8 = scmp.lt.s32.totalorder %s2155_s23, 3  ;;  %p2740_p9 = scmp.ge.s32.totalorder %s2155_s23, 1 }
  0x40   : > { %s2742_s0 = sld [smem:[#allocation24_spill]]  ;;  %s248_s26 = scalar_lea.vmem [#allocation2], %s2272_s10 }
  0x41   : > { %p2332_p11 = pnand %p2740_p9, %p2739_p8  ;;  %s260_s1 = sshll.u32 %s248_s26, 4  ;;  %s2343_s1 = int_to_ptr.vmem [resolvable:$true] %s260_s1 }
  0x42   : > { %s2349_s7 = scalar_lea.hbm %s2708_s2, %s2275_s11  ;;  %s245_s28 = scalar_lea.sflag [#allocation3], %s2269_s9 }
  0x43   : > { %s2741_s17 = scalar_select %p2332_p11, 1, 0 }
  0x46   : > { %s2340_s15 = scalar_lea.hbm %s2742_s0, %s2275_s11  ;;  %s1948_s23 = scalar_lea.hbm %s2742_s0, 2048 }
  0x47   : > { %s1943_s20 = scalar_lea.hbm %s2340_s15, 1024  ;;  %p1949_p6 = scmp.lt.u32.totalorder %s2340_s15, %s2742_s0 }
  0x48   : > { %p1944_p12 = scmp.ne.s32.totalorder %s2340_s15, %s1943_s20  ;;  %p1950_p13 = scmp.lt.u32.totalorder %s1948_s23, %s1943_s20 }
  0x49   : > { %p1952_p5 = scmp.lt.u32.totalorder %s1943_s20, %s2340_s15 }
  0x4a   : > { %p1946_p1 = pnand %p1944_p12, %p2301_p4  ;;  %p1951_p3 = por %p1950_p13, %p1949_p6 }
  0x4c   : > { %p1947_p2 = pneg %p1946_p1  ;;  %p1953_p7 = por %p1952_p5, %p1951_p3 }
  0x4e   : > { %p1954_p10 = pnand %p1953_p7, %p1947_p2 }
  0x50   : > { %1957 = shalt.err (!%p1954_p10)
}
  0x51   : > { %s1958_s11 = scalar_lea.vmem %s2343_s1, 1024  ;;  %s2160_s26 = smov [#allocation2]  }
  0x52   : > { %p1959_p8 = scmp.ne.s32.totalorder %s2343_s1, %s1958_s11  ;;  %s1963_s16 = sshll.u32 %s2160_s26, 4  ;;  %s1964_s16 = int_to_ptr.vmem [resolvable:$false] %s1963_s16 }
  0x53   : > { %s1965_s18 = scalar_lea.vmem %s1964_s16, 2048  ;;  %p1966_p1 = scmp.lt.s32.totalorder %s2343_s1, %s1964_s16 }
  0x54   : > { %p1961_p9 = pnand %p1959_p8, %p2301_p4  ;;  %p1967_p11 = scmp.lt.s32.totalorder %s1965_s18, %s1958_s11 }
  0x56   : > { %p1962_p12 = pneg %p1961_p9  ;;  %p1968_p6 = por %p1967_p11, %p1966_p1 }
  0x58   : > { %p1969_p13 = pnand %p1968_p6, %p1962_p12 }
  0x5a   : > { %1972 = shalt.err (!%p1969_p13)
}
  0x5b   : > { %s2743_s20 = smov 8   ;;  %s2744_s23 = smov 128  }
  0x5c   : > { %1807 = dma.hbm_to_vmem [thread:$0]  (!%p2279_p0), %s2340_s15, 1024, %s2343_s1, %s245_s28, %s2744_s23, %s2744_s23, %s2743_s20  }
  0x5d   : > { %s298_s8 = scalar_lea.vmem [#allocation7], %s2272_s10  ;;  %s1580_s13 = sshll.u32 %s2269_s9, 4 }
  0x5e   : > { %s308_s25 = sshll.u32 %s298_s8, 4  ;;  %s1973_s14 = scalar_lea.hbm %s2349_s7, 1024  ;;  %s2379_s25 = int_to_ptr.vmem [resolvable:$true] %s308_s25 }
  0x5f   : > { %p1974_p11 = scmp.ne.s32.totalorder %s2349_s7, %s1973_s14  ;;  %s1978_s16 = scalar_lea.hbm %s2708_s2, 2048 }
  0x60   : > { %p1979_p5 = scmp.lt.u32.totalorder %s2349_s7, %s2708_s2  ;;  %p1980_p7 = scmp.lt.u32.totalorder %s1978_s16, %s1973_s14 }
  0x61   : > { %p1976_p2 = pnand %p1974_p11, %p2301_p4  ;;  %p1982_p8 = scmp.lt.u32.totalorder %s1973_s14, %s2349_s7 }
  0x62   : > { %p1981_p10 = por %p1980_p7, %p1979_p5 }
  0x63   : > { %p1977_p3 = pneg %p1976_p2 }
  0x64   : > { %p1983_p9 = por %p1982_p8, %p1981_p10 }
  0x66   : > { %p1984_p12 = pnand %p1983_p9, %p1977_p3 }
  0x68   : > { %1987 = shalt.err (!%p1984_p12)
}
  0x69   : > { %s1988_s1 = scalar_lea.vmem %s2379_s25, 1024  ;;  %s2161_s10 = smov [#allocation7]  }
  0x6a   : > { %p1989_p1 = scmp.ne.s32.totalorder %s2379_s25, %s1988_s1  ;;  %s1993_s28 = sshll.u32 %s2161_s10, 4  ;;  %s1994_s28 = int_to_ptr.vmem [resolvable:$false] %s1993_s28 }
  0x6b   : > { %s1995_s0 = scalar_lea.vmem %s1994_s28, 2048  ;;  %p1996_p11 = scmp.lt.s32.totalorder %s2379_s25, %s1994_s28 }
  0x6c   : > { %p1991_p6 = pnand %p1989_p1, %p2301_p4  ;;  %p1997_p2 = scmp.lt.s32.totalorder %s1995_s0, %s1988_s1 }
  0x6e   : > { %p1992_p13 = pneg %p1991_p6  ;;  %p1998_p5 = por %p1997_p2, %p1996_p11 }
  0x70   : > { %p1999_p7 = pnand %p1998_p5, %p1992_p13 }
  0x72   : > { %2002 = shalt.err (!%p1999_p7)
}
  0x73   : > { %1813 = dma.hbm_to_vmem [thread:$0]  (!%p2279_p0), %s2349_s7, 1024, %s2379_s25, %s2295_s27, %s2744_s23, %s2744_s23, %s2743_s20  }
  0x74   : > { %s1661_s15 = sshll.u32 %s2151_s22, 8  ;;  %s322_s26 = scalar_lea.vmem [#allocation8], %s1580_s13 }
  0x75   : > { %s2411_s11 = scalar_lea.hbm %s2709_s3, %s1661_s15  ;;  %s334_s16 = sshll.u32 %s322_s26, 4  ;;  %s2415_s16 = int_to_ptr.vmem [resolvable:$true] %s334_s16 }
  0x76   : > { %s319_s18 = scalar_lea.sflag [#allocation9], %s2269_s9  ;;  %s2003_s1 = scalar_lea.hbm %s2411_s11, 256 }
  0x77   : > { %p2004_p3 = scmp.ne.s32.totalorder %s2411_s11, %s2003_s1  ;;  %s2008_s20 = scalar_lea.hbm %s2709_s3, 512 }
  0x78   : > { %p2009_p9 = scmp.lt.u32.totalorder %s2411_s11, %s2709_s3  ;;  %p2010_p12 = scmp.lt.u32.totalorder %s2008_s20, %s2003_s1 }
  0x79   : > { %p2006_p10 = pnand %p2004_p3, %p2301_p4  ;;  %p2012_p6 = scmp.lt.u32.totalorder %s2003_s1, %s2411_s11 }
  0x7a   : > { %p2011_p1 = por %p2010_p12, %p2009_p9 }
  0x7b   : > { %p2007_p8 = pneg %p2006_p10 }
  0x7c   : > { %p2013_p13 = por %p2012_p6, %p2011_p1 }
  0x7e   : > { %p2014_p11 = pnand %p2013_p13, %p2007_p8 }
  0x80   : > { %2017 = shalt.err (!%p2014_p11)
}
  0x81   : > { %s2018_s13 = scalar_lea.vmem %s2415_s16, 256  ;;  %s2162_s10 = smov [#allocation8]  }
  0x82   : > { %p2019_p2 = scmp.ne.s32.totalorder %s2415_s16, %s2018_s13  ;;  %s2023_s28 = sshll.u32 %s2162_s10, 4  ;;  %s2024_s28 = int_to_ptr.vmem [resolvable:$false] %s2023_s28 }
  0x83   : > { %s2025_s0 = scalar_lea.vmem %s2024_s28, 512  ;;  %p2026_p3 = scmp.lt.s32.totalorder %s2415_s16, %s2024_s28 }
  0x84   : > { %p2021_p5 = pnand %p2019_p2, %p2301_p4  ;;  %p2027_p10 = scmp.lt.s32.totalorder %s2025_s0, %s2018_s13 }
  0x86   : > { %p2022_p7 = pneg %p2021_p5  ;;  %p2028_p9 = por %p2027_p10, %p2026_p3 }
  0x88   : > { %p2029_p12 = pnand %p2028_p9, %p2022_p7 }
  0x8a   : > { %2032 = shalt.err (!%p2029_p12)
}
  0x8b   : > { %s2163_s15 = smov 32   ;;  %s2164_s8 = smov 2  }
  0x8c   : > { %1816 = dma.hbm_to_vmem [thread:$0]  (!%p2279_p0), %s2411_s11, 256, %s2415_s16, %s319_s18, %s2163_s15, %s2163_s15, %s2164_s8  }
  0x8d   : > { %p2745_p4 = scmp.ne.s32.totalorder %s2741_s17, 0 }
  0x8e   : > { %s2444_s29 = sand.u32 (!%p2745_p4), 1, %s2139_s19   ;;  %p2746_p8 = scmp.ne.s32.totalorder (!%p2745_p4), %s2731_s30, 0 }
  0x8f   : > { %346 = sbr.rel (%p2745_p4) target bundleno = 2538 (0x9ea), region = 36  ;;  %s2447_s14 = sshll.u32 (!%p2745_p4), %s2444_s29, 6 }
  0x90   : > { %s349_s26 = scalar_lea.sflag (!%p2745_p4), [#allocation3], %s2444_s29  ;;  %s2451_s1 = scalar_lea.vmem (!%p2745_p4), [#allocation2], %s2447_s14 }
  0x96   : > { %2114 = dma.done.wait (%p2746_p8), %s349_s26, 1024  }
  0x97   : > { %2116 = vsyncadd (%p2746_p8), %s349_s26, 4294966272  ;;  %s357_s9 = sand.u32 1, %s2231_s24   ;;  %s2459_s17 = scalar_lea.vmem [#allocation5], %s2447_s14 }
  0x98   : > { %s358_s12 = scalar_lea.sflag [#allocation6], %s357_s9 }
  0x99   : > { %2118 = dma.done.wait (%p2746_p8), %s358_s12, 2048  }
  0x9a   : > { %2120 = vsyncadd (%p2746_p8), %s358_s12, 4294965248  ;;  %s1587_s11 = sshll.u32 %s2444_s29, 4  ;;  %s2467_s16 = scalar_lea.vmem [#allocation7], %s2447_s14 }
  0x9b   : > { %s376_s18 = scalar_lea.sflag [#allocation9], %s2444_s29  ;;  %s2470_s27 = scalar_lea.vmem [#allocation8], %s1587_s11 }
  0x9c   : > { %2122 = dma.done.wait (%p2746_p8), %s376_s18, 256  }
  0x9d   : > { %2124 = vsyncadd (%p2746_p8), %s376_s18, 4294967040  ;;  %vm444_vm0 = vcmask 261120   ;;  %v442_v1 = vld [vmem:[%s2459_s17] sm:$0xff]  ;;  %v443_v2 = vld [vmem:[%s2459_s17 + $0x8] sm:$0xff]  ;;  %v2165_v10 = vmov 0   ;;  %vm544_vm5 = vcmask 130048  }
  0x9e   : > { %vm2478_vm1 = vmpackc.low %vm444_vm0, %vm444_vm0  ;;  %v438_v3 = vld [vmem:[%s2451_s1] sm:$0xff]  ;;  %v1752_v4 = vpack.c.bf16 %v443_v2, %v442_v1  ;;  %v439_v6 = vld [vmem:[%s2451_s1 + $0x8] sm:$0xff]  ;;  %s2509_s24 = scalar_lea.vmem [#allocation11], %s2447_s14  ;;  %s2526_s30 = scalar_lea.vmem [#allocation10], %s2447_s14 }
  0x9f   : > { %v440_v5 = vmul.f32 0.17677669, %v438_v3  ;;  %v441_v7 = vmul.f32 0.17677669, %v439_v6  ;;  %v532_v8 = vld [vmem:[%s2470_s27] sm:$0x3] }
  0xa0   : > { %1754 = vmatprep.subr.msk.bf16.mxu0 %vm2478_vm1, %v1752_v4  ;;  %v533_v9 = vld [vmem:[%s2470_s27 + $0x2] sm:$0x3]  ;;  %vm534_vm2 = vnez %v532_v8  ;;  %v568_v32 = vld [vmem:[%s2467_s16 + $0x8] sm:$0xff]  ;;  %v1599_v35 = vld [vmem:[%s2459_s17 + $0x18] sm:$0xff]  ;;  %s1662_s7 = sshll.u32 %s2147_s21, 10  ;;  %s1359_s20 = sshll.u32 %s2509_s24, 4  ;;  %s2613_s20 = int_to_ptr.vmem [resolvable:$true] %s1359_s20 }
  0xa1   : > { %1700 = vmatprep.mubr.msk.f32.mxu0 %vm444_vm0, %v440_v5  ;;  %1757 = vmatpush3.bf16.xpose.msk.msra.mxu0 %vm2478_vm1, %v1752_v4  ;;  %vm535_vm3 = vnez %v533_v9  ;;  %v536_v11 = vsel %vm534_vm2, 16843009, %v2165_v10  ;;  %v567_v31 = vld [vmem:[%s2467_s16] sm:$0xff]  ;;  %v1598_v34 = vld [vmem:[%s2459_s17 + $0x10] sm:$0xff]  ;;  %v1597_v45 = vld [vmem:[%s2451_s1 + $0x18] sm:$0xff]  ;;  %s2611_s13 = scalar_lea.hbm %s2711_s5, %s1662_s7  ;;  %s1320_s10 = scalar_lea.sflag [#allocation12], %s2444_s29 }
  0xa2   : > { %v537_v12 = vsel %vm535_vm3, 16843009, %v2165_v10  ;;  %v538_v13 = vunpack.c.0.s8 %v536_v11  ;;  %v1758_v33 = vpack.c.bf16 %v568_v32, %v567_v31  ;;  %v1762_v36 = vpack.c.bf16 %v1599_v35, %v1598_v34  ;;  %v1596_v41 = vld [vmem:[%s2451_s1 + $0x10] sm:$0xff]  ;;  %v1607_v9 = vld [vmem:[%s2467_s16 + $0x18] sm:$0xff]  ;;  %s2033_s28 = scalar_lea.vmem %s2613_s20, 1024  ;;  %p2749_p1 = scmp.ne.s32.totalorder %s2732_s6, 0 }
  0xa3   : > { %v539_v14 = vunpack.c.0.s8 %v537_v12  ;;  %v657_v43 = vmul.f32 0.17677669, %v1596_v41  ;;  %v658_v46 = vmul.f32 0.17677669, %v1597_v45  ;;  %v1605_v47 = vld [vmem:[%s2470_s27 + $0x6] sm:$0x3]  ;;  %p2034_p0 = scmp.ne.s32.totalorder %s2613_s20, %s2033_s28 }
  0xa4   : > { %vm540_vm4 = vcmp.ne.s32.totalorder %v538_v13, 0  ;;  %1759 = vmatprep.subr.bf16.mxu1 %v1758_v33  ;;  %v1604_v48 = vld [vmem:[%s2470_s27 + $0x4] sm:$0x3]  ;;  %vm753_vm7 = vnez %v1605_v47  ;;  %v1617_v13 = vld [vmem:[%s2459_s17 + $0x28] sm:$0xff]  ;;  %s2166_s0 = smov [#allocation11]  }
  0xa5   : > { %vm541_vm6 = vcmp.ne.s32.totalorder %v539_v14, 0  ;;  %1761 = vmatpush3.bf16.msra.mxu1 %v1758_v33  ;;  %vm752_vm8 = vnez %v1604_v48  ;;  %v755_v49 = vsel %vm753_vm7, 16843009, %v2165_v10  ;;  %v1606_v8 = vld [vmem:[%s2467_s16 + $0x10] sm:$0xff]  ;;  %v1616_v12 = vld [vmem:[%s2459_s17 + $0x20] sm:$0xff]  ;;  %p2035_p6 = pnand %p2034_p0, %p2749_p1  ;;  %s2037_s15 = sshll.u32 %s2166_s0, 4  ;;  %s2038_s15 = int_to_ptr.vmem [resolvable:$false] %s2037_s15 }
  0xa6   : > { %1764 = vmatprep.subr.msk.bf16.mxu1 %vm2478_vm1, %v1762_v36  ;;  %v754_v51 = vsel %vm752_vm8, 16843009, %v2165_v10  ;;  %v757_v53 = vunpack.c.0.s8 %v755_v49  ;;  %v1768_v11 = vpack.c.bf16 %v1607_v9, %v1606_v8  ;;  %v1772_v14 = vpack.c.bf16 %v1617_v13, %v1616_v12  ;;  %v1624_v49 = vld [vmem:[%s2467_s16 + $0x20] sm:$0xff]  ;;  %s2039_s8 = scalar_lea.vmem %s2038_s15, 2048  ;;  %p2040_p11 = scmp.lt.s32.totalorder %s2613_s20, %s2038_s15 }
  0xa7   : > { %v756_v54 = vunpack.c.0.s8 %v754_v51  ;;  %p2036_p13 = pneg %p2035_p6  ;;  %p2041_p2 = scmp.lt.s32.totalorder %s2039_s8, %s2033_s28 }
  0xa8   : > { %1701 = vmatmul.mubr.msk.f32.vlgmr.msra.gmra.mrb[0].mxu0 %vm444_vm0, %v441_v7  ;;  %vm759_vm9 = vcmp.ne.s32.totalorder %v757_v53, 0  ;;  %1769 = vmatprep.subr.bf16.mxu0 %v1768_v11  ;;  %v1635_v53 = vld [vmem:[%s2459_s17 + $0x38] sm:$0xff] }
  0xa9   : > { %vm758_vm10 = vcmp.ne.s32.totalorder %v756_v54, 0  ;;  %1771 = vmatpush3.bf16.msra.mxu0 %v1768_v11  ;;  %p2042_p5 = por %p2041_p2, %p2040_p11 }
  0xaa   : > { %1774 = vmatprep.subr.msk.bf16.mxu0 %vm2478_vm1, %v1772_v14 }
  0xab   : > { %p2043_p7 = pnand %p2042_p5, %p2036_p13 }
 0x17b   : > { %v1702_v15 = vpop.f32.mrb[0].mxu0 }
 0x17c   : > { %v523_v16 = vpop.f32.mrb[1].mxu0  ;;  %v543_v19 = vsel %vm541_vm6, -1e+09, %v1702_v15 }
 0x17d   : > { %v542_v17 = vsel %vm540_vm4, -1e+09, %v523_v16  ;;  %v548_v20 = vsel %vm544_vm5, %v543_v19, -inf }
 0x17e   : > { %v545_v18 = vsel %vm544_vm5, %v542_v17, -inf }
 0x17f   : > { %546 = vmax.xlane.f32.xlu0 %v545_v18 }
 0x183   : > { %549 = vmax.xlane.f32.xlu0 %v548_v20 }
 0x20c   : > { %v547_v21 = vpop.xlane.xlu0 %546 }
 0x20d   : > { %v551_v22 = vsub.f32 %v542_v17, %v547_v21  ;;  %v1614_v17 = vld [vmem:[%s2451_s1 + $0x20] sm:$0xff] }
 0x20f   : > { %v553_v23 = vmul.f32 1.442695, %v551_v22  ;;  %v877_v22 = vmul.f32 0.17677669, %v1614_v17 }
 0x210   : > { %v550_v24 = vpop.xlane.xlu0 %549 }
 0x211   : > { %1881 = vpow2.f32 %v553_v23  ;;  %v552_v25 = vsub.f32 %v543_v19, %v550_v24  ;;  %v1615_v23 = vld [vmem:[%s2451_s1 + $0x28] sm:$0xff] }
 0x212   : > { %v878_v24 = vmul.f32 0.17677669, %v1615_v23 }
 0x213   : > { %v555_v26 = vmul.f32 1.442695, %v552_v25  ;;  %v1623_v25 = vld [vmem:[%s2470_s27 + $0xa] sm:$0x3] }
 0x214   : > { %vm973_vm11 = vnez %v1623_v25  ;;  %v1642_v25 = vld [vmem:[%s2467_s16 + $0x30] sm:$0xff] }
 0x215   : > { %1883 = vpow2.f32 %v555_v26  ;;  %v1622_v26 = vld [vmem:[%s2470_s27 + $0x8] sm:$0x3] }
 0x216   : > { %vm972_vm12 = vnez %v1622_v26  ;;  %v1643_v26 = vld [vmem:[%s2467_s16 + $0x38] sm:$0xff] }
 0x21b   : > { %v1882_v27 = vpop.eup %1881 }
 0x21c   : > { %v557_v28 = vsel %vm544_vm5, %v1882_v27, 0.0 }
 0x21d   : > { %558 = vadd.xlane.f32.xlu1 %v557_v28 }
 0x21f   : > { %v1884_v29 = vpop.eup %1883 }
 0x220   : > { %v560_v30 = vsel %vm544_vm5, %v1884_v29, 0.0 }
 0x221   : > { %561 = vadd.xlane.f32.xlu1 %v560_v30 }
 0x2aa   : > { %v559_v37 = vpop.xlane.xlu1 %558 }
 0x2ab   : > { %1885 = vrcp.f32 %v559_v37 }
 0x2ae   : > { %v562_v38 = vpop.xlane.xlu1 %561 }
 0x2af   : > { %1887 = vrcp.f32 %v562_v38 }
 0x2b5   : > { %v1886_v39 = vpop.eup %1885 }
 0x2b6   : > { %v565_v40 = vmul.f32 %v1886_v39, %v1882_v27  ;;  %v975_v27 = vsel %vm973_vm11, 16843009, %v2165_v10 }
 0x2b7   : > { %v977_v31 = vunpack.c.0.s8 %v975_v27  ;;  %v1788_v27 = vpack.c.bf16 %v1643_v26, %v1642_v25 }
 0x2b8   : > { %1707 = vmatprep.mubr.msk.f32.mxu1 %vm544_vm5, %v565_v40  ;;  %652 = vst.msk [vmem:[%s2509_s24] sm:$0xff] %vm544_vm5, %v565_v40 }
 0x2b9   : > { %v1888_v42 = vpop.eup %1887  ;;  %vm979_vm13 = vcmp.ne.s32.totalorder %v977_v31, 0 }
 0x2ba   : > { %v566_v44 = vmul.f32 %v1888_v42, %v1884_v29  ;;  %v974_v29 = vsel %vm972_vm12, 16843009, %v2165_v10 }
 0x2bb   : > { %v976_v32 = vunpack.c.0.s8 %v974_v29 }
 0x2bc   : > { %1708 = vmatmul.mubr.msk.f32.vlgmr.msra.gmra.mrb[0].mxu1 %vm544_vm5, %v566_v44  ;;  %653 = vst.msk [vmem:[%s2509_s24 + $0x8] sm:$0xff] %vm544_vm5, %v566_v44 }
 0x2bd   : > { %1767 = vmatpush3.bf16.xpose.msk.msra.mxu1 %vm2478_vm1, %v1762_v36  ;;  %1714 = vmatprep.mubr.msk.f32.mxu1 %vm444_vm0, %v657_v43  ;;  %vm978_vm14 = vcmp.ne.s32.totalorder %v976_v32, 0 }
 0x2c4   : > { %1715 = vmatmul.mubr.msk.f32.vlgmr.msra.gmra.mrb[2].mxu1 %vm444_vm0, %v658_v46 }
 0x38f   : > { %v1709_v50 = vpop.f32.mrb[0].mxu1 }
 0x390   : > { %651 = vst.msk [vmem:[%s2526_s30 + $0x8] sm:$0xff] %vm444_vm0, %v1709_v50  ;;  %v641_v52 = vpop.f32.mrb[1].mxu1  ;;  %v1625_v50 = vld [vmem:[%s2467_s16 + $0x28] sm:$0xff] }
 0x391   : > { %650 = vst.msk [vmem:[%s2526_s30] sm:$0xff] %vm444_vm0, %v641_v52  ;;  %v1778_v51 = vpack.c.bf16 %v1625_v50, %v1624_v49  ;;  %v1634_v52 = vld [vmem:[%s2459_s17 + $0x30] sm:$0xff] }
 0x392   : > { %v1782_v54 = vpack.c.bf16 %v1635_v53, %v1634_v52 }
 0x393   : > { %1779 = vmatprep.subr.bf16.mxu1 %v1778_v51 }
 0x394   : > { %1781 = vmatpush3.bf16.msra.mxu1 %v1778_v51 }
 0x395   : > { %1784 = vmatprep.subr.msk.bf16.mxu1 %vm2478_vm1, %v1782_v54 }
 0x397   : > { %v1716_v55 = vpop.f32.mrb[2].mxu1 }
 0x398   : > { %v761_v56 = vsel %vm759_vm9, -1e+09, %v1716_v55  ;;  %v740_v57 = vpop.f32.mrb[3].mxu1 }
 0x399   : > { %v760_v58 = vsel %vm758_vm10, -1e+09, %v740_v57  ;;  %v765_v59 = vsel %vm544_vm5, %v761_v56, -inf  ;;  %v1632_v57 = vld [vmem:[%s2451_s1 + $0x30] sm:$0xff] }
 0x39a   : > { %766 = vmax.xlane.f32.xlu1 %v765_v59  ;;  %v762_v60 = vsel %vm544_vm5, %v760_v58, -inf }
 0x39b   : > { %763 = vmax.xlane.f32.xlu0 %v762_v60 }
 0x427   : > { %v767_v61 = vpop.xlane.xlu1 %766 }
 0x428   : > { %v769_v62 = vsub.f32 %v761_v56, %v767_v61  ;;  %v764_v63 = vpop.xlane.xlu0 %763 }
 0x429   : > { %v768_v1 = vsub.f32 %v760_v58, %v764_v63  ;;  %v1633_v63 = vld [vmem:[%s2451_s1 + $0x38] sm:$0xff] }
 0x42a   : > { %v772_v2 = vmul.f32 1.442695, %v769_v62  ;;  %v1097_v62 = vmul.f32 0.17677669, %v1632_v57 }
 0x42b   : > { %v770_v3 = vmul.f32 1.442695, %v768_v1  ;;  %v1098_v1 = vmul.f32 0.17677669, %v1633_v63 }
 0x42c   : > { %1889 = vpow2.f32 %v772_v2  ;;  %v1641_v2 = vld [vmem:[%s2470_s27 + $0xe] sm:$0x3] }
 0x42d   : > { %1891 = vpow2.f32 %v770_v3  ;;  %v1640_v3 = vld [vmem:[%s2470_s27 + $0xc] sm:$0x3]  ;;  %vm1193_vm15 = vnez %v1641_v2 }
 0x42e   : > { %vm1192_vm2 = vnez %v1640_v3 }
 0x436   : > { %v1890_v4 = vpop.eup %1889 }
 0x437   : > { %v1892_v5 = vpop.eup %1891  ;;  %v777_v6 = vsel %vm544_vm5, %v1890_v4, 0.0 }
 0x438   : > { %778 = vadd.xlane.f32.xlu1 %v777_v6  ;;  %v774_v7 = vsel %vm544_vm5, %v1892_v5, 0.0  ;;  %v1194_v6 = vsel %vm1192_vm2, 16843009, %v2165_v10 }
 0x439   : > { %775 = vadd.xlane.f32.xlu0 %v774_v7  ;;  %v1196_v8 = vunpack.c.0.s8 %v1194_v6 }
 0x43b   : > { %vm1198_vm3 = vcmp.ne.s32.totalorder %v1196_v8, 0 }
 0x4c5   : > { %v779_v15 = vpop.xlane.xlu1 %778 }
 0x4c6   : > { %1893 = vrcp.f32 %v779_v15  ;;  %v776_v16 = vpop.xlane.xlu0 %775 }
 0x4c7   : > { %1895 = vrcp.f32 %v776_v16 }
 0x4d0   : > { %v1894_v18 = vpop.eup %1893 }
 0x4d1   : > { %v1896_v19 = vpop.eup %1895  ;;  %v783_v20 = vmul.f32 %v1894_v18, %v1890_v4  ;;  %v1195_v4 = vsel %vm1193_vm15, 16843009, %v2165_v10 }
 0x4d2   : > { %v782_v21 = vmul.f32 %v1896_v19, %v1892_v5  ;;  %v1197_v0 = vunpack.c.0.s8 %v1195_v4 }
 0x4d3   : > { %1613 = vst.msk [vmem:[%s2509_s24 + $0x18] sm:$0xff] %vm544_vm5, %v783_v20 }
 0x4d4   : > { %1721 = vmatprep.mubr.msk.f32.mxu0 %vm544_vm5, %v782_v21  ;;  %1612 = vst.msk [vmem:[%s2509_s24 + $0x10] sm:$0xff] %vm544_vm5, %v782_v21 }
 0x4d5   : > { %1722 = vmatmul.mubr.msk.f32.vlgmr.msra.gmra.mrb[2].mxu0 %vm544_vm5, %v783_v20 }
 0x4d6   : > { %1777 = vmatpush3.bf16.xpose.msk.msra.mxu0 %vm2478_vm1, %v1772_v14  ;;  %1728 = vmatprep.mubr.msk.f32.mxu0 %vm444_vm0, %v877_v22 }
 0x4d7   : > { %1789 = vmatprep.subr.bf16.mxu0 %v1788_v27 }
 0x4dd   : > { %1729 = vmatmul.mubr.msk.f32.vlgmr.msra.gmra.mrb[4].mxu0 %vm444_vm0, %v878_v24 }
 0x4de   : > { %1791 = vmatpush3.bf16.msra.mxu0 %v1788_v27 }
 0x5a8   : > { %v1723_v28 = vpop.f32.mrb[2].mxu0 }
 0x5a9   : > { %1611 = vst.msk [vmem:[%s2526_s30 + $0x18] sm:$0xff] %vm444_vm0, %v1723_v28  ;;  %v859_v30 = vpop.f32.mrb[3].mxu0 }
 0x5aa   : > { %1610 = vst.msk [vmem:[%s2526_s30 + $0x10] sm:$0xff] %vm444_vm0, %v859_v30 }
 0x5b0   : > { %v1730_v33 = vpop.f32.mrb[4].mxu0 }
 0x5b1   : > { %v981_v34 = vsel %vm979_vm13, -1e+09, %v1730_v33  ;;  %v960_v35 = vpop.f32.mrb[5].mxu0 }
 0x5b2   : > { %v980_v36 = vsel %vm978_vm14, -1e+09, %v960_v35  ;;  %v985_v37 = vsel %vm544_vm5, %v981_v34, -inf }
 0x5b3   : > { %986 = vmax.xlane.f32.xlu1 %v985_v37  ;;  %v982_v38 = vsel %vm544_vm5, %v980_v36, -inf }
 0x5b4   : > { %983 = vmax.xlane.f32.xlu0 %v982_v38 }
 0x640   : > { %v987_v39 = vpop.xlane.xlu1 %986 }
 0x641   : > { %v989_v40 = vsub.f32 %v981_v34, %v987_v39  ;;  %v984_v41 = vpop.xlane.xlu0 %983 }
 0x642   : > { %v988_v42 = vsub.f32 %v980_v36, %v984_v41 }
 0x643   : > { %v992_v43 = vmul.f32 1.442695, %v989_v40 }
 0x644   : > { %v990_v44 = vmul.f32 1.442695, %v988_v42 }
 0x645   : > { %1897 = vpow2.f32 %v992_v43 }
 0x646   : > { %1899 = vpow2.f32 %v990_v44 }
 0x64f   : > { %v1898_v45 = vpop.eup %1897 }
 0x650   : > { %v1900_v46 = vpop.eup %1899  ;;  %v997_v47 = vsel %vm544_vm5, %v1898_v45, 0.0 }
 0x651   : > { %998 = vadd.xlane.f32.xlu1 %v997_v47  ;;  %v994_v48 = vsel %vm544_vm5, %v1900_v46, 0.0 }
 0x652   : > { %995 = vadd.xlane.f32.xlu0 %v994_v48 }
 0x6de   : > { %v999_v55 = vpop.xlane.xlu1 %998 }
 0x6df   : > { %1901 = vrcp.f32 %v999_v55  ;;  %v996_v56 = vpop.xlane.xlu0 %995 }
 0x6e0   : > { %1903 = vrcp.f32 %v996_v56 }
 0x6e9   : > { %v1902_v58 = vpop.eup %1901 }
 0x6ea   : > { %v1904_v59 = vpop.eup %1903  ;;  %v1003_v60 = vmul.f32 %v1902_v58, %v1898_v45 }
 0x6eb   : > { %v1002_v61 = vmul.f32 %v1904_v59, %v1900_v46 }
 0x6ec   : > { %1631 = vst.msk [vmem:[%s2509_s24 + $0x28] sm:$0xff] %vm544_vm5, %v1003_v60 }
 0x6ed   : > { %1735 = vmatprep.mubr.msk.f32.mxu1 %vm544_vm5, %v1002_v61  ;;  %1630 = vst.msk [vmem:[%s2509_s24 + $0x20] sm:$0xff] %vm544_vm5, %v1002_v61 }
 0x6ee   : > { %1736 = vmatmul.mubr.msk.f32.vlgmr.msra.gmra.mrb[4].mxu1 %vm544_vm5, %v1003_v60 }
 0x6ef   : > { %1787 = vmatpush3.bf16.xpose.msk.msra.mxu1 %vm2478_vm1, %v1782_v54  ;;  %1742 = vmatprep.mubr.msk.f32.mxu1 %vm444_vm0, %v1097_v62  ;;  %vm1199_vm1 = vcmp.ne.s32.totalorder %v1197_v0, 0 }
 0x6f6   : > { %1743 = vmatmul.mubr.msk.f32.vlgmr.msra.gmra.mrb[6].mxu1 %vm444_vm0, %v1098_v1 }
 0x7c1   : > { %v1737_v5 = vpop.f32.mrb[4].mxu1 }
 0x7c2   : > { %1629 = vst.msk [vmem:[%s2526_s30 + $0x28] sm:$0xff] %vm444_vm0, %v1737_v5  ;;  %v1079_v7 = vpop.f32.mrb[5].mxu1 }
 0x7c3   : > { %1628 = vst.msk [vmem:[%s2526_s30 + $0x20] sm:$0xff] %vm444_vm0, %v1079_v7 }
 0x7c9   : > { %v1744_v9 = vpop.f32.mrb[6].mxu1 }
 0x7ca   : > { %v1201_v11 = vsel %vm1199_vm1, -1e+09, %v1744_v9  ;;  %v1180_v12 = vpop.f32.mrb[7].mxu1 }
 0x7cb   : > { %v1200_v13 = vsel %vm1198_vm3, -1e+09, %v1180_v12  ;;  %v1205_v14 = vsel %vm544_vm5, %v1201_v11, -inf }
 0x7cc   : > { %1206 = vmax.xlane.f32.xlu1 %v1205_v14  ;;  %v1202_v15 = vsel %vm544_vm5, %v1200_v13, -inf }
 0x7cd   : > { %1203 = vmax.xlane.f32.xlu0 %v1202_v15 }
 0x859   : > { %v1207_v10 = vpop.xlane.xlu1 %1206 }
 0x85a   : > { %v1209_v16 = vsub.f32 %v1201_v11, %v1207_v10  ;;  %v1204_v17 = vpop.xlane.xlu0 %1203 }
 0x85b   : > { %v1208_v18 = vsub.f32 %v1200_v13, %v1204_v17 }
 0x85c   : > { %v1212_v19 = vmul.f32 1.442695, %v1209_v16 }
 0x85d   : > { %v1210_v20 = vmul.f32 1.442695, %v1208_v18 }
 0x85e   : > { %1905 = vpow2.f32 %v1212_v19 }
 0x85f   : > { %1907 = vpow2.f32 %v1210_v20 }
 0x868   : > { %v1906_v21 = vpop.eup %1905 }
 0x869   : > { %v1908_v22 = vpop.eup %1907  ;;  %v1217_v23 = vsel %vm544_vm5, %v1906_v21, 0.0 }
 0x86a   : > { %1218 = vadd.xlane.f32.xlu1 %v1217_v23  ;;  %v1214_v24 = vsel %vm544_vm5, %v1908_v22, 0.0 }
 0x86b   : > { %1215 = vadd.xlane.f32.xlu0 %v1214_v24 }
 0x8f7   : > { %v1219_v28 = vpop.xlane.xlu1 %1218 }
 0x8f8   : > { %1909 = vrcp.f32 %v1219_v28  ;;  %v1216_v29 = vpop.xlane.xlu0 %1215 }
 0x8f9   : > { %1911 = vrcp.f32 %v1216_v29 }
 0x902   : > { %v1910_v30 = vpop.eup %1909 }
 0x903   : > { %v1912_v31 = vpop.eup %1911  ;;  %v1223_v32 = vmul.f32 %v1910_v30, %v1906_v21 }
 0x904   : > { %v1222_v33 = vmul.f32 %v1912_v31, %v1908_v22 }
 0x905   : > { %1649 = vst.msk [vmem:[%s2509_s24 + $0x38] sm:$0xff] %vm544_vm5, %v1223_v32 }
 0x906   : > { %1749 = vmatprep.mubr.msk.f32.mxu0 %vm544_vm5, %v1222_v33  ;;  %1648 = vst.msk [vmem:[%s2509_s24 + $0x30] sm:$0xff] %vm544_vm5, %v1222_v33 }
 0x907   : > { %1750 = vmatmul.mubr.msk.f32.vlgmr.msra.gmra.mrb[6].mxu0 %vm544_vm5, %v1223_v32 }
 0x908   : > { %2046 = shalt.err (!%p2043_p7)
}
 0x909   : > { %s2047_s14 = scalar_lea.hbm %s2611_s13, 1024  ;;  %s2051_s9 = scalar_lea.hbm %s2711_s5, 2048 }
 0x90a   : > { %p2048_p3 = scmp.ne.s32.totalorder %s2611_s13, %s2047_s14  ;;  %p2052_p12 = scmp.lt.u32.totalorder %s2611_s13, %s2711_s5 }
 0x90b   : > { %p2053_p4 = scmp.lt.u32.totalorder %s2051_s9, %s2047_s14  ;;  %p2055_p0 = scmp.lt.u32.totalorder %s2047_s14, %s2611_s13 }
 0x90c   : > { %p2049_p10 = pnand %p2048_p3, %p2749_p1 }
 0x90d   : > { %p2054_p8 = por %p2053_p4, %p2052_p12 }
 0x90e   : > { %p2050_p9 = pneg %p2049_p10 }
 0x90f   : > { %p2056_p6 = por %p2055_p0, %p2054_p8 }
 0x911   : > { %p2057_p13 = pnand %p2056_p6, %p2050_p9 }
 0x913   : > { %2060 = shalt.err (!%p2057_p13)
}
 0x914   : > { %s2167_s11 = smov 128   ;;  %s2168_s16 = smov 8  }
 0x915   : > { %1801 = dma.vmem_to_hbm [thread:$0]  (%p2749_p1), %s2613_s20, 1024, %s2611_s13, %s1320_s10, %s2167_s11, %s2167_s11, %s2168_s16  }
 0x916   : > { %s1338_s18 = sshll.u32 %s2526_s30, 4  ;;  %s2650_s23 = scalar_lea.hbm %s2710_s4, %s1662_s7  ;;  %s2643_s18 = int_to_ptr.vmem [resolvable:$true] %s1338_s18 }
 0x917   : > { %s1315_s25 = scalar_lea.sflag [#allocation4], %s2444_s29  ;;  %s2061_s20 = scalar_lea.vmem %s2643_s18, 1024 }
 0x918   : > { %p2062_p11 = scmp.ne.s32.totalorder %s2643_s18, %s2061_s20  ;;  %s2169_s13 = smov [#allocation10]  }
 0x919   : > { %s2065_s10 = sshll.u32 %s2169_s13, 4  ;;  %s2066_s10 = int_to_ptr.vmem [resolvable:$false] %s2065_s10 }
 0x91a   : > { %p2063_p2 = pnand %p2062_p11, %p2749_p1  ;;  %s2067_s21 = scalar_lea.vmem %s2066_s10, 2048 }
 0x91b   : > { %p2068_p7 = scmp.lt.s32.totalorder %s2643_s18, %s2066_s10  ;;  %p2069_p3 = scmp.lt.s32.totalorder %s2067_s21, %s2061_s20 }
 0x91c   : > { %p2064_p5 = pneg %p2063_p2 }
 0x91d   : > { %p2070_p10 = por %p2069_p3, %p2068_p7 }
 0x91f   : > { %p2071_p9 = pnand %p2070_p10, %p2064_p5 }
 0x9da   : > { %v1751_v34 = vpop.f32.mrb[6].mxu0 }
 0x9db   : > { %1647 = vst.msk [vmem:[%s2526_s30 + $0x38] sm:$0xff] %vm444_vm0, %v1751_v34  ;;  %v1299_v35 = vpop.f32.mrb[7].mxu0 }
 0x9dc   : > { %1646 = vst.msk [vmem:[%s2526_s30 + $0x30] sm:$0xff] %vm444_vm0, %v1299_v35 }
 0x9dd   : > { %2074 = shalt.err (!%p2071_p9)
}
 0x9de   : > { %s2075_s30 = scalar_lea.hbm %s2650_s23, 1024  ;;  %s2079_s0 = scalar_lea.hbm %s2710_s4, 2048 }
 0x9df   : > { %p2076_p12 = scmp.ne.s32.totalorder %s2650_s23, %s2075_s30  ;;  %p2080_p0 = scmp.lt.u32.totalorder %s2650_s23, %s2710_s4 }
 0x9e0   : > { %p2081_p6 = scmp.lt.u32.totalorder %s2079_s0, %s2075_s30  ;;  %p2083_p11 = scmp.lt.u32.totalorder %s2075_s30, %s2650_s23 }
 0x9e1   : > { %p2077_p4 = pnand %p2076_p12, %p2749_p1 }
 0x9e2   : > { %p2082_p13 = por %p2081_p6, %p2080_p0 }
 0x9e3   : > { %p2078_p8 = pneg %p2077_p4 }
 0x9e4   : > { %p2084_p2 = por %p2083_p11, %p2082_p13 }
 0x9e6   : > { %p2085_p5 = pnand %p2084_p2, %p2078_p8 }
 0x9e8   : > { %2088 = shalt.err (!%p2085_p5)
}
 0x9e9   : > { %1800 = dma.vmem_to_hbm [thread:$0]  (%p2749_p1), %s2643_s18, 1024, %s2650_s23, %s1315_s25, %s2167_s11, %s2167_s11, %s2168_s16  }
 0x9ea PF: > { %s2750_s14 = sld [smem:[#allocation18_spill]]  ;;  %s2751_s26 = sld [smem:[#allocation23_spill]] }
 0x9eb   : > { %s2752_s1 = sld [smem:[#allocation20_spill]] }
 0x9f0   : > { %s1374_s9 = sand.u32 1, %s2750_s14   ;;  %p2753_p7 = scmp.ne.s32.totalorder %s2751_s26, 0 }
 0x9f1   : > { %p2754_p3 = scmp.ge.s32.totalorder %s2752_s1, 2  ;;  %s1375_s12 = scalar_lea.sflag [#allocation4], %s1374_s9 }
 0x9f3   : > { %p1818_p10 = pnand %p2754_p3, %p2753_p7 }
 0x9f5   : > { %2126 = dma.done.wait (!%p1818_p10), %s1375_s12, 1024  }
 0x9f6   : > { %2128 = vsyncadd (!%p1818_p10), %s1375_s12, 4294966272  ;;  %s1384_s6 = scalar_lea.sflag [#allocation12], %s1374_s9 }
 0x9f7   : > { %2130 = dma.done.wait (!%p1818_p10), %s1384_s6, 1024  }
 0x9f8   : > { %2132 = vsyncadd (!%p1818_p10), %s1384_s6, 4294966272  ;;  %s31_s23 = sadd.s32 1, %s2752_s1   ;;  %s2755_s29 = sld [smem:[#allocation19_spill]] }
 0x9f9   : > { %p28_p9 = scmp.ge.s32.totalorder %s31_s23, 4   ;;  %s2756_s20 = sld [smem:[#allocation22_spill]] }
 0x9fa   : > { %s2757_s17 = sld [smem:[#allocation21_spill]]  ;;  %s2758_s18 = smov %s2139_s19 }
 0x9fb   : > { %s2760_s21 = smov %s2151_s22  ;;  %30 = sbr.rel (!%p28_p9) target bundleno = 15 (0xf), region = 153 }
 0x9fe   : > { %s2759_s19 = smov %s2755_s29 }
 0xa00   : > { %s2761_s22 = smov %s2757_s17 }
 0xa02   :  { %1389 = vsyncpa [#allocation3], 1 }
 0xa03   :  { %1391 = vsyncpa [#allocation3 + $0x1], 1 }
 0xa04   :  { %1392 = vsyncpa [#allocation6], 1 }
 0xa05   :  { %1394 = vsyncpa [#allocation6 + $0x1], 1 }
 0xa06   :  { %1395 = vsyncpa [#allocation9], 1 }
 0xa07   :  { %1397 = vsyncpa [#allocation9 + $0x1], 1 }
 0xa08   :  { %1398 = vsyncpa [#allocation4], 1 }
 0xa09   :  { %1400 = vsyncpa [#allocation4 + $0x1], 1 }
 0xa0a   :  { %1401 = vsyncpa [#allocation12], 1 }
 0xa0b   :  { %1403 = vsyncpa [#allocation12 + $0x1], 1 }

</bundles_post_ra>
